<compile_context>
chip_gen: v7x
topology: tpu7x:2x2x1
jax: 0.10.0
libtpu: 0.0.40
codegen_flags: <defaults>
</compile_context>

<pallas_src>
import jax
import jax.numpy as jnp
from jax.experimental import pallas as pl
from jax.experimental.pallas import tpu as pltpu


def _round_up(x, m):
    return ((x + m - 1) // m) * m


def _choose_batch_tiling(B):
    """Pick (TB, B_pad) for the batch grid.

    Goals:
      * small padding waste (no blind round-up to a fixed 512-row cap),
      * >= 2 grid steps (>= 4 once B is large) so the ("parallel",) axis
        actually shards across v7x's two TensorCores and the x/out DMA
        pipeline stays overlapped,
      * tiles may grow past 512 rows (up to 2048) to amortize the ~0.35 us
        per-grid-step overhead; per-step VMEM stays tiny on every generation.
    """
    B8 = _round_up(B, 8)
    if B8 <= 128:                 # tiny batch: one step, pure overhead anyway
        return B8, B8
    MAX_TB = 2048
    min_steps = 4 if B8 >= 512 else 2
    n_steps = max(min_steps, pl.cdiv(B8, MAX_TB))
    TB = _round_up(pl.cdiv(B8, n_steps), 16)   # 16: bf16 sublane packing
    B_pad = _round_up(B8, TB)
    return TB, B_pad


def actor_mlp_kernel(x_ref, w1_ref, b1_ref, w2_ref, b2_ref, w3_ref, b3_ref,
                     out_ref):
    # One batch tile: three MXU matmuls (bf16 in, f32 accumulate), f32 epilogue.
    # x_ref already holds the MXU dtype (cast in the wrapper), K of the first
    # matmul is the real state size S (no 128-padding of x in HBM).
    x = x_ref[...]                      # (TB, S)   bf16/f32
    b1 = b1_ref[...]                    # (1, Hp)   f32  -- read once per tile
    b2 = b2_ref[...]                    # (1, Hp)
    b3 = b3_ref[...]                    # (1, Ap)

    h1 = jnp.dot(x, w1_ref[...], preferred_element_type=jnp.float32)
    h1 = jnp.maximum(h1 + b1, 0.0)      # f32 bias + ReLU on VPU (v5e-safe)

    h2 = jnp.dot(h1.astype(w2_ref.dtype), w2_ref[...],
                 preferred_element_type=jnp.float32)
    h2 = jnp.maximum(h2 + b2, 0.0)

    y = jnp.dot(h2.astype(w3_ref.dtype), w3_ref[...],
                preferred_element_type=jnp.float32)
    out_ref[...] = (y + b3).astype(out_ref.dtype)   # lane-dense 128-wide store


def actor_forward(state, params, *, use_bf16=True):
    """state: (B, S) f32.  params: (in, out)-layout weights + (1, out) biases.

    Returns (B, A) float32 (matches the PyTorch forward; internally the kernel
    emits bf16 to halve HBM writeback when use_bf16=True).
    """
    B, S = state.shape
    H = params["w1"].shape[1]
    A = params["w3"].shape[1]

    # Hidden/action feature dims are zero-padded to 128 lanes (zeros are
    # numerically inert: padded bias = 0 -> ReLU(0) = 0 contributes nothing).
    H_pad = _round_up(H, 128)
    A_pad = _round_up(A, 128)

    TB, B_pad = _choose_batch_tiling(B)
    grid = (B_pad // TB,)

    wdtype = jnp.bfloat16 if use_bf16 else jnp.float32
    odtype = jnp.bfloat16 if use_bf16 else jnp.float32

    def pad2(a, rows, cols, dtype=None):
        if dtype is not None:
            a = a.astype(dtype)
        return jnp.pad(a, ((0, rows - a.shape[0]), (0, cols - a.shape[1])))

    # x: batch-padded only; feature dim stays at its real size S and is fed in
    # the MXU dtype already (minimal HBM read bytes).
    x_p = pad2(state, B_pad, S, wdtype)
    w1 = pad2(params["w1"], S, H_pad, wdtype)
    w2 = pad2(params["w2"], H_pad, H_pad, wdtype)
    w3 = pad2(params["w3"], H_pad, A_pad, wdtype)
    b1 = pad2(params["b1"], 1, H_pad, jnp.float32)
    b2 = pad2(params["b2"], 1, H_pad, jnp.float32)
    b3 = pad2(params["b3"], 1, A_pad, jnp.float32)

    wbytes = 2 if use_bf16 else 4
    obytes = 2 if use_bf16 else 4
    cost = pl.CostEstimate(
        flops=2 * B_pad * (S * H_pad + H_pad * H_pad + H_pad * A_pad),
        transcendentals=0,
        bytes_accessed=(wbytes * B_pad * S                                  # x
                        + wbytes * (S * H_pad + H_pad * H_pad + H_pad * A_pad)
                        + 4 * (2 * H_pad + A_pad)                           # biases
                        + obytes * B_pad * A_pad),                          # out
    )

    # Weights/biases resident in VMEM (constant block index).  Single-buffering
    # them (pipeline_mode=pl.Buffered(1)) would save ~100 KiB VMEM; irrelevant
    # at these sizes, so the default is kept.
    resident = lambda shape: pl.BlockSpec(shape, lambda i: (0, 0))

    out_p = pl.pallas_call(
        actor_mlp_kernel,
        out_shape=jax.ShapeDtypeStruct((B_pad, A_pad), odtype),
        grid=grid,
        in_specs=[
            pl.BlockSpec((TB, S), lambda i: (i, 0)),   # x: tiled over batch
            resident((S, H_pad)), resident((1, H_pad)),
            resident((H_pad, H_pad)), resident((1, H_pad)),
            resident((H_pad, A_pad)), resident((1, A_pad)),
        ],
        out_specs=pl.BlockSpec((TB, A_pad), lambda i: (i, 0)),
        compiler_params=pltpu.CompilerParams(
            dimension_semantics=("parallel",)),
        cost_estimate=cost,
    )(x_p, w1, b1, w2, b2, w3, b3)

    # Padded batch rows / action lanes hold numerically-inert garbage -> slice.
    return out_p[:B, :A].astype(jnp.float32)


def init_actor_params(key, state_size, hidden_size, action_size):
    """Deterministic synthetic params. Weights stored already transposed to
    (in, out) so the kernel computes x @ W + b (== PyTorch x @ W_pt.T + b)."""
    ks = jax.random.split(key, 6)
    scale = 0.1
    return {
        "w1": scale * jax.random.normal(ks[0], (state_size, hidden_size), jnp.float32),
        "b1": scale * jax.random.normal(ks[1], (1, hidden_size), jnp.float32),
        "w2": scale * jax.random.normal(ks[2], (hidden_size, hidden_size), jnp.float32),
        "b2": scale * jax.random.normal(ks[3], (1, hidden_size), jnp.float32),
        "w3": scale * jax.random.normal(ks[4], (hidden_size, action_size), jnp.float32),
        "b3": scale * jax.random.normal(ks[5], (1, action_size), jnp.float32),
    }


def actor_ref(state, params, *, use_bf16=True):
    """Pure-JAX reference matching the kernel's mixed-precision recipe
    (bf16 MXU inputs, f32 accumulate/epilogue, bf16 output store)."""
    cast = (lambda a: a.astype(jnp.bfloat16)) if use_bf16 else (lambda a: a)
    dot = lambda a, b: jnp.dot(cast(a), cast(b), preferred_element_type=jnp.float32)
    h1 = jnp.maximum(dot(state, params["w1"]) + params["b1"], 0.0)
    h2 = jnp.maximum(dot(h1, params["w2"]) + params["b2"], 0.0)
    y = dot(h2, params["w3"]) + params["b3"]
    if use_bf16:
        y = y.astype(jnp.bfloat16)
    return y.astype(jnp.float32)


def actor_ref_f32(state, params):
    """Full-f32 reference (sanity only; bf16 MXU is an intentional deviation)."""
    h1 = jnp.maximum(state @ params["w1"] + params["b1"], 0.0)
    h2 = jnp.maximum(h1 @ params["w2"] + params["b2"], 0.0)
    return h2 @ params["w3"] + params["b3"]


if __name__ == "__main__":
    # Small shapes implied by the module: env.state_size, hidden_size, env.action_size
    batch_size = 8
    state_size = 8
    hidden_size = 32
    action_size = 4

    key = jax.random.PRNGKey(0)
    k_params, k_state, k_state2 = jax.random.split(key, 3)

    params = init_actor_params(k_params, state_size, hidden_size, action_size)

    # --- case 1: tiny batch (single grid step) -------------------------------
    state = jax.random.normal(k_state, (batch_size, state_size), jnp.float32)
    out = jax.block_until_ready(actor_forward(state, params))
    assert out.shape == (batch_size, action_size)

    ref = actor_ref(state, params)
    assert jnp.allclose(out, ref, atol=5e-3, rtol=5e-3), (
        f"max abs err vs bf16 ref: {jnp.max(jnp.abs(out - ref))}")

    ref32 = actor_ref_f32(state, params)
    assert jnp.allclose(out, ref32, atol=5e-2, rtol=5e-2), (
        f"max abs err vs f32 ref: {jnp.max(jnp.abs(out - ref32))}")

    # --- case 2: awkward batch (multi-step grid + padded junk rows sliced off)
    state2 = jax.random.normal(k_state2, (200, state_size), jnp.float32)
    out2 = jax.block_until_ready(actor_forward(state2, params))
    assert out2.shape == (200, action_size)
    ref2 = actor_ref(state2, params)
    assert jnp.allclose(out2, ref2, atol=5e-3, rtol=5e-3), (
        f"max abs err vs bf16 ref (B=200): {jnp.max(jnp.abs(out2 - ref2))}")

    print("KERNEL_OK")
</pallas_src>

<mosaic_0001>
module attributes {stable_mosaic.version = 11 : i64} {
  func.func @actor_mlp_kernel(%arg0: i32, %arg1: memref<8x8xbf16, #tpu.memory_space<vmem>>, %arg2: memref<8x128xbf16, #tpu.memory_space<vmem>>, %arg3: memref<1x128xf32, #tpu.memory_space<vmem>>, %arg4: memref<128x128xbf16, #tpu.memory_space<vmem>>, %arg5: memref<1x128xf32, #tpu.memory_space<vmem>>, %arg6: memref<128x128xbf16, #tpu.memory_space<vmem>>, %arg7: memref<1x128xf32, #tpu.memory_space<vmem>>, %arg8: memref<8x128xbf16, #tpu.memory_space<vmem>>) attributes {dimension_semantics = [#tpu.dimension_semantics<parallel>], iteration_bounds = array<i64: 1>, scalar_prefetch = 0 : i64, scratch_operands = 0 : i64, tpu.core_type = #tpu.core_type<tc>, window_params = [{transform_indices = @transform_0, window_bounds = array<i64: 8, 8>}, {pipeline_mode = #tpu.pipeline_mode<synchronous>, transform_indices = @transform_1, window_bounds = array<i64: 8, 128>}, {pipeline_mode = #tpu.pipeline_mode<synchronous>, transform_indices = @transform_2, window_bounds = array<i64: 1, 128>}, {pipeline_mode = #tpu.pipeline_mode<synchronous>, transform_indices = @transform_3, window_bounds = array<i64: 128, 128>}, {pipeline_mode = #tpu.pipeline_mode<synchronous>, transform_indices = @transform_4, window_bounds = array<i64: 1, 128>}, {pipeline_mode = #tpu.pipeline_mode<synchronous>, transform_indices = @transform_5, window_bounds = array<i64: 128, 128>}, {pipeline_mode = #tpu.pipeline_mode<synchronous>, transform_indices = @transform_6, window_bounds = array<i64: 1, 128>}, {transform_indices = @transform_7, window_bounds = array<i64: 8, 128>}]} {
    %c0 = arith.constant 0 : index
    %c0_0 = arith.constant 0 : index
    %0 = vector.load %arg1[%c0, %c0_0] : memref<8x8xbf16, #tpu.memory_space<vmem>>, vector<8x8xbf16>
    %c0_1 = arith.constant 0 : index
    %c0_2 = arith.constant 0 : index
    %1 = vector.load %arg3[%c0_1, %c0_2] : memref<1x128xf32, #tpu.memory_space<vmem>>, vector<1x128xf32>
    %c0_3 = arith.constant 0 : index
    %c0_4 = arith.constant 0 : index
    %2 = vector.load %arg5[%c0_3, %c0_4] : memref<1x128xf32, #tpu.memory_space<vmem>>, vector<1x128xf32>
    %c0_5 = arith.constant 0 : index
    %c0_6 = arith.constant 0 : index
    %3 = vector.load %arg7[%c0_5, %c0_6] : memref<1x128xf32, #tpu.memory_space<vmem>>, vector<1x128xf32>
    %c0_7 = arith.constant 0 : index
    %c0_8 = arith.constant 0 : index
    %4 = vector.load %arg2[%c0_7, %c0_8] : memref<8x128xbf16, #tpu.memory_space<vmem>>, vector<8x128xbf16>
    %cst = arith.constant dense<0.000000e+00> : vector<8x128xf32>
    %5 = tpu.matmul %0, %4, %cst {dimension_numbers = #tpu.dot_dimension_numbers<[1], [0], [0], [1], [0, 0, 1, 1], [], []>} : vector<8x8xbf16>, vector<8x128xbf16>, vector<8x128xf32> -> vector<8x128xf32>
    %6 = vector.broadcast %1 : vector<1x128xf32> to vector<8x128xf32>
    %7 = arith.addf %5, %6 : vector<8x128xf32>
    %cst_9 = arith.constant 0.000000e+00 : f32
    %8 = vector.broadcast %cst_9 : f32 to vector<8x128xf32>
    %9 = arith.maximumf %7, %8 : vector<8x128xf32>
    %10 = arith.truncf %9 : vector<8x128xf32> to vector<8x128xbf16>
    %c0_10 = arith.constant 0 : index
    %c0_11 = arith.constant 0 : index
    %11 = vector.load %arg4[%c0_10, %c0_11] : memref<128x128xbf16, #tpu.memory_space<vmem>>, vector<128x128xbf16>
    %cst_12 = arith.constant dense<0.000000e+00> : vector<8x128xf32>
    %12 = tpu.matmul %10, %11, %cst_12 {dimension_numbers = #tpu.dot_dimension_numbers<[1], [0], [0], [1], [0, 0, 1, 1], [], []>} : vector<8x128xbf16>, vector<128x128xbf16>, vector<8x128xf32> -> vector<8x128xf32>
    %13 = vector.broadcast %2 : vector<1x128xf32> to vector<8x128xf32>
    %14 = arith.addf %12, %13 : vector<8x128xf32>
    %cst_13 = arith.constant 0.000000e+00 : f32
    %15 = vector.broadcast %cst_13 : f32 to vector<8x128xf32>
    %16 = arith.maximumf %14, %15 : vector<8x128xf32>
    %17 = arith.truncf %16 : vector<8x128xf32> to vector<8x128xbf16>
    %c0_14 = arith.constant 0 : index
    %c0_15 = arith.constant 0 : index
    %18 = vector.load %arg6[%c0_14, %c0_15] : memref<128x128xbf16, #tpu.memory_space<vmem>>, vector<128x128xbf16>
    %cst_16 = arith.constant dense<0.000000e+00> : vector<8x128xf32>
    %19 = tpu.matmul %17, %18, %cst_16 {dimension_numbers = #tpu.dot_dimension_numbers<[1], [0], [0], [1], [0, 0, 1, 1], [], []>} : vector<8x128xbf16>, vector<128x128xbf16>, vector<8x128xf32> -> vector<8x128xf32>
    %20 = vector.broadcast %3 : vector<1x128xf32> to vector<8x128xf32>
    %21 = arith.addf %19, %20 : vector<8x128xf32>
    %22 = arith.truncf %21 : vector<8x128xf32> to vector<8x128xbf16>
    %c0_17 = arith.constant 0 : index
    %c0_18 = arith.constant 0 : index
    %23 = vector.load %arg8[%c0_17, %c0_18] : memref<8x128xbf16, #tpu.memory_space<vmem>>, vector<8x128xbf16>
    tpu.vector_store %arg8[%c0_17, %c0_18], %22 {strides = array<i32>} : memref<8x128xbf16, #tpu.memory_space<vmem>>, vector<8x128xbf16>,
    return
  }
  func.func @transform_0(%arg0: i32) -> (i32, i32) {
    %c0_i32 = arith.constant 0 : i32
    %c0_i32_0 = arith.constant 0 : i32
    return %arg0, %c0_i32 : i32, i32
  }
  func.func @transform_1(%arg0: i32) -> (i32, i32) {
    %c0_i32 = arith.constant 0 : i32
    %c0_i32_0 = arith.constant 0 : i32
    %c0_i32_1 = arith.constant 0 : i32
    return %c0_i32, %c0_i32_0 : i32, i32
  }
  func.func @transform_2(%arg0: i32) -> (i32, i32) {
    %c0_i32 = arith.constant 0 : i32
    %c0_i32_0 = arith.constant 0 : i32
    %c0_i32_1 = arith.constant 0 : i32
    return %c0_i32, %c0_i32_0 : i32, i32
  }
  func.func @transform_3(%arg0: i32) -> (i32, i32) {
    %c0_i32 = arith.constant 0 : i32
    %c0_i32_0 = arith.constant 0 : i32
    %c0_i32_1 = arith.constant 0 : i32
    return %c0_i32, %c0_i32_0 : i32, i32
  }
  func.func @transform_4(%arg0: i32) -> (i32, i32) {
    %c0_i32 = arith.constant 0 : i32
    %c0_i32_0 = arith.constant 0 : i32
    %c0_i32_1 = arith.constant 0 : i32
    return %c0_i32, %c0_i32_0 : i32, i32
  }
  func.func @transform_5(%arg0: i32) -> (i32, i32) {
    %c0_i32 = arith.constant 0 : i32
    %c0_i32_0 = arith.constant 0 : i32
    %c0_i32_1 = arith.constant 0 : i32
    return %c0_i32, %c0_i32_0 : i32, i32
  }
  func.func @transform_6(%arg0: i32) -> (i32, i32) {
    %c0_i32 = arith.constant 0 : i32
    %c0_i32_0 = arith.constant 0 : i32
    %c0_i32_1 = arith.constant 0 : i32
    return %c0_i32, %c0_i32_0 : i32, i32
  }
  func.func @transform_7(%arg0: i32) -> (i32, i32) {
    %c0_i32 = arith.constant 0 : i32
    %c0_i32_0 = arith.constant 0 : i32
    return %arg0, %c0_i32 : i32, i32
  }
}

</mosaic_0001>

<bundles_post_ra>
// kernel: tpu_custom_call.1
= control target key start
LH: loop header
LB: loop body
LE: loop exit
PB: predicated region body
PF: predicated region fallthrough
CT: control target
= control target key end

     0   :  { %12 = vsyncpa [#allocation3], 0  ;;  %s751_s0 = inlined_call_operand.hbm [shape: bf16[8,8], index: 0, kind: input, shape index: {}]   ;;  %s752_s1 = inlined_call_operand.hbm [shape: bf16[8,128], index: 1, kind: input, shape index: {}]   ;;  %s753_s2 = inlined_call_operand.vmem [shape: f32[1,128], index: 2, kind: input, shape index: {}]   ;;  %s754_s3 = inlined_call_operand.hbm [shape: bf16[128,128], index: 3, kind: input, shape index: {}]   ;;  %s755_s4 = inlined_call_operand.vmem [shape: f32[1,128], index: 4, kind: input, shape index: {}]   ;;  %s756_s5 = inlined_call_operand.hbm [shape: bf16[128,128], index: 5, kind: input, shape index: {}]   ;;  %s757_s6 = inlined_call_operand.vmem [shape: f32[1,128], index: 6, kind: input, shape index: {}]   ;;  %s758_s7 = inlined_call_operand.hbm [shape: bf16[8,128], index: 7, kind: output, shape index: {}]  }
   0x1   :  { %13 = vsyncpa [#allocation6], 0 }
   0x2   :  { %14 = vsyncpa [#allocation9], 0 }
   0x3   :  { %15 = vsyncpa [#allocation4], 0  ;;  %s610_s24 = smov [#allocation5]   ;;  %s611_s26 = smov [#allocation2]  }
   0x4   :  { %s32_s25 = sshll.u32 %s610_s24, 4  ;;  %s22_s27 = sshll.u32 %s611_s26, 4  ;;  %s33_s25 = int_to_ptr.vmem [resolvable:$true] %s32_s25  ;;  %s23_s27 = int_to_ptr.vmem [resolvable:$true] %s22_s27 }
   0x5   :  { %s492_s30 = scalar_lea.hbm %s752_s1, 64 }
   0x6   :  { %p493_p0 = scmp.ne.s32.totalorder %s752_s1, %s492_s30  ;;  %p496_p1 = scmp.lt.u32.totalorder %s492_s30, %s752_s1 }
   0x8   :  { %p498_p2 = pnand %p496_p1, %p493_p0 }
   0xa   :  { %501 = shalt.err (!%p498_p2)
}
   0xb   :  { %s502_s12 = scalar_lea.vmem %s33_s25, 64  ;;  %p507_p4 = scmp.lt.s32.totalorder %s33_s25, %s33_s25 }
   0xc   :  { %p503_p3 = scmp.ne.s32.totalorder %s33_s25, %s502_s12  ;;  %p508_p5 = scmp.lt.s32.totalorder %s502_s12, %s502_s12 }
   0xe   :  { %p509_p6 = por %p508_p5, %p507_p4 }
  0x10   :  { %p510_p7 = pnand %p509_p6, %p503_p3 }
  0x12   :  { %513 = shalt.err (!%p510_p7)
}
  0x13   :  { %35 = dma.hbm_to_vmem [thread:$0]  %s752_s1, 64, %s33_s25, [#allocation6]  }
  0x14   :  { %s514_s17 = scalar_lea.hbm %s751_s0, 64 }
  0x15   :  { %p515_p8 = scmp.ne.s32.totalorder %s751_s0, %s514_s17  ;;  %p518_p9 = scmp.lt.u32.totalorder %s514_s17, %s751_s0 }
  0x17   :  { %p520_p10 = pnand %p518_p9, %p515_p8 }
  0x19   :  { %523 = shalt.err (!%p520_p10)
}
  0x1a   :  { %s524_s22 = scalar_lea.vmem %s23_s27, 64  ;;  %p529_p12 = scmp.lt.s32.totalorder %s23_s27, %s23_s27 }
  0x1b   :  { %p525_p11 = scmp.ne.s32.totalorder %s23_s27, %s524_s22  ;;  %p530_p13 = scmp.lt.s32.totalorder %s524_s22, %s524_s22 }
  0x1d   :  { %p531_p0 = por %p530_p13, %p529_p12 }
  0x1f   :  { %p532_p1 = pnand %p531_p0, %p525_p11 }
  0x21   :  { %535 = shalt.err (!%p532_p1)
}
  0x22   :  { %25 = dma.hbm_to_vmem [thread:$0]  %s751_s0, 64, %s23_s27, [#allocation3]  }
  0x23   :  { %s612_s24 = smov [#allocation7]   ;;  %s536_s29 = scalar_lea.hbm %s754_s3, 1024 }
  0x24   :  { %s43_s25 = sshll.u32 %s612_s24, 4  ;;  %p537_p2 = scmp.ne.s32.totalorder %s754_s3, %s536_s29  ;;  %s44_s25 = int_to_ptr.vmem [resolvable:$true] %s43_s25 }
  0x25   :  { %p540_p3 = scmp.lt.u32.totalorder %s536_s29, %s754_s3 }
  0x27   :  { %p542_p4 = pnand %p540_p3, %p537_p2 }
  0x29   :  { %545 = shalt.err (!%p542_p4)
}
  0x2a   :  { %s546_s11 = scalar_lea.vmem %s44_s25, 1024  ;;  %p551_p6 = scmp.lt.s32.totalorder %s44_s25, %s44_s25 }
  0x2b   :  { %p547_p5 = scmp.ne.s32.totalorder %s44_s25, %s546_s11  ;;  %p552_p7 = scmp.lt.s32.totalorder %s546_s11, %s546_s11 }
  0x2d   :  { %p553_p8 = por %p552_p7, %p551_p6 }
  0x2f   :  { %p554_p9 = pnand %p553_p8, %p547_p5 }
  0x31   :  { %557 = shalt.err (!%p554_p9)
}
  0x32   :  { %s613_s0 = smov 64   ;;  %s614_s27 = smov 4  }
  0x33   :  { %49 = dma.hbm_to_vmem [thread:$0]  %s754_s3, 1024, %s44_s25, [#allocation6], %s613_s0, %s613_s0, %s614_s27  }
  0x34   :  { %s615_s14 = smov [#allocation8]   ;;  %s558_s18 = scalar_lea.hbm %s756_s5, 1024 }
  0x35   :  { %s57_s15 = sshll.u32 %s615_s14, 4  ;;  %p559_p10 = scmp.ne.s32.totalorder %s756_s5, %s558_s18  ;;  %s58_s15 = int_to_ptr.vmem [resolvable:$true] %s57_s15 }
  0x36   :  { %p562_p11 = scmp.lt.u32.totalorder %s558_s18, %s756_s5 }
  0x38   :  { %p564_p12 = pnand %p562_p11, %p559_p10 }
  0x3a   :  { %567 = shalt.err (!%p564_p12)
}
  0x3b   :  { %s568_s1 = scalar_lea.vmem %s58_s15, 1024  ;;  %p573_p0 = scmp.lt.s32.totalorder %s58_s15, %s58_s15 }
  0x3c   :  { %p569_p13 = scmp.ne.s32.totalorder %s58_s15, %s568_s1  ;;  %p574_p1 = scmp.lt.s32.totalorder %s568_s1, %s568_s1 }
  0x3e   :  { %p575_p2 = por %p574_p1, %p573_p0 }
  0x40   :  { %p576_p3 = pnand %p575_p2, %p569_p13 }
  0x42   :  { %579 = shalt.err (!%p576_p3)
}
  0x43   :  { %63 = dma.hbm_to_vmem [thread:$0]  %s756_s5, 1024, %s58_s15, [#allocation9], %s613_s0, %s613_s0, %s614_s27  }
  0x44   :  { %602 = dma.done.wait [#allocation3], 64  }
  0x45   :  { %603 = vsyncadd [#allocation3], 4294967232 }
  0x46   :  { %604 = dma.done.wait [#allocation6], 1088  }
  0x47   :  { %605 = vsyncadd [#allocation6], 4294966208 }
  0x48   :  { %606 = dma.done.wait [#allocation9], 1024  }
  0x49   :  { %607 = vsyncadd [#allocation9], 4294966272  ;;  %v616_v0 = vmov 0.0   ;;  %vm617_vm0 = vmmov 0   ;;  %vm94_vm1 = vcmask 1043456   ;;  %vm90_vm2 = vcmask 64512  }
  0x4a   :  { %421 = vmatprep.subr.bf16.mxu0 %v616_v0  ;;  %423 = vmatprep.mubr.msk.bf16.mxu0 %vm617_vm0, %v616_v0  ;;  %v83_v1 = vld [vmem:[#allocation5] sm:$0xf]  ;;  %v476_v3 = vld [vmem:[#allocation7] sm:$0xff]   ;;  %v79_v4 = vld [vmem:[#allocation2] sm:$0xf]  ;;  %s618_s29 = smov [#allocation10]  }
  0x4b   :  { %427 = vmatprep.subr.bf16.mxu1 %v616_v0  ;;  %443 = vmatprep.mubr.msk.bf16.mxu1 %vm617_vm0, %v616_v0  ;;  %v96_v2 = vsel %vm94_vm1, %v83_v1, 0  ;;  %v477_v5 = vld [vmem:[#allocation7 + $0x8] sm:$0xff]   ;;  %v478_v6 = vld [vmem:[#allocation7 + $0x10] sm:$0xff]   ;;  %v479_v7 = vld [vmem:[#allocation7 + $0x18] sm:$0xff]   ;;  %s370_s30 = sshll.u32 %s618_s29, 4  ;;  %s371_s30 = int_to_ptr.vmem [resolvable:$true] %s370_s30 }
  0x4c   :  { %422 = vmatpush3.bf16.msra.mxu0 %v96_v2  ;;  %428 = vmatpush3.bf16.msra.mxu1 %v476_v3  ;;  %v480_v8 = vld [vmem:[#allocation7 + $0x20] sm:$0xff]   ;;  %v481_v9 = vld [vmem:[#allocation7 + $0x28] sm:$0xff]   ;;  %v482_v10 = vld [vmem:[#allocation7 + $0x30] sm:$0xff]   ;;  %p585_p5 = scmp.lt.s32.totalorder %s371_s30, %s371_s30 }
  0x4d   :  { %447 = vmatprep.subr.bf16.mxu0 %v616_v0  ;;  %429 = vmatprep.subr.bf16.mxu1 %v616_v0  ;;  %v483_v11 = vld [vmem:[#allocation7 + $0x38] sm:$0xff]   ;;  %v484_v12 = vld [vmem:[#allocation8] sm:$0xff]   ;;  %v485_v13 = vld [vmem:[#allocation8 + $0x8] sm:$0xff]  }
  0x4e   :  { %v486_v14 = vld [vmem:[#allocation8 + $0x10] sm:$0xff]   ;;  %v487_v15 = vld [vmem:[#allocation8 + $0x18] sm:$0xff]   ;;  %v488_v16 = vld [vmem:[#allocation8 + $0x20] sm:$0xff]  }
  0x4f   :  { %424 = vmatmul.mubr.msk.bf16.vlgmr.msra.gmra.mrb[0].mxu0 %vm90_vm2, %v79_v4  ;;  %v489_v17 = vld [vmem:[#allocation8 + $0x28] sm:$0xff]   ;;  %v381_v18 = vld [vmem:[%s753_s2] ss:$0 sm:$0xff]  ;;  %v490_v26 = vld [vmem:[#allocation8 + $0x30] sm:$0xff]  }
  0x50   :  { %463 = vmatprep.mubr.msk.bf16.mxu0 %vm617_vm0, %v616_v0  ;;  %430 = vmatpush3.bf16.msra.mxu1 %v477_v5  ;;  %v491_v27 = vld [vmem:[#allocation8 + $0x38] sm:$0xff]  }
  0x51   :  { %431 = vmatprep.subr.bf16.mxu1 %v616_v0  ;;  %448 = vmatpush3.bf16.msra.mxu0 %v484_v12  ;;  %v383_v28 = vld [vmem:[%s755_s4] ss:$0 sm:$0xff]  ;;  %s580_s4 = scalar_lea.vmem %s371_s30, 64 }
  0x52   :  { %449 = vmatprep.subr.bf16.mxu0 %v616_v0  ;;  %v392_v36 = vld [vmem:[%s757_s6] ss:$0 sm:$0xff]  ;;  %p581_p4 = scmp.ne.s32.totalorder %s371_s30, %s580_s4  ;;  %p586_p6 = scmp.lt.s32.totalorder %s580_s4, %s580_s4 }
  0x54   :  { %432 = vmatpush3.bf16.msra.mxu1 %v478_v6  ;;  %p587_p7 = por %p586_p6, %p585_p5 }
  0x55   :  { %433 = vmatprep.subr.bf16.mxu1 %v616_v0  ;;  %450 = vmatpush3.bf16.msra.mxu0 %v485_v13 }
  0x56   :  { %451 = vmatprep.subr.bf16.mxu0 %v616_v0  ;;  %p588_p8 = pnand %p587_p7, %p581_p4 }
  0x58   :  { %434 = vmatpush3.bf16.msra.mxu1 %v479_v7 }
  0x59   :  { %435 = vmatprep.subr.bf16.mxu1 %v616_v0  ;;  %452 = vmatpush3.bf16.msra.mxu0 %v486_v14 }
  0x5a   :  { %453 = vmatprep.subr.bf16.mxu0 %v616_v0 }
  0x5c   :  { %436 = vmatpush3.bf16.msra.mxu1 %v480_v8 }
  0x5d   :  { %437 = vmatprep.subr.bf16.mxu1 %v616_v0  ;;  %454 = vmatpush3.bf16.msra.mxu0 %v487_v15 }
  0x5e   :  { %455 = vmatprep.subr.bf16.mxu0 %v616_v0 }
  0x60   :  { %438 = vmatpush3.bf16.msra.mxu1 %v481_v9 }
  0x61   :  { %439 = vmatprep.subr.bf16.mxu1 %v616_v0  ;;  %456 = vmatpush3.bf16.msra.mxu0 %v488_v16 }
  0x62   :  { %457 = vmatprep.subr.bf16.mxu0 %v616_v0 }
  0x64   :  { %440 = vmatpush3.bf16.msra.mxu1 %v482_v10 }
  0x65   :  { %441 = vmatprep.subr.bf16.mxu1 %v616_v0  ;;  %458 = vmatpush3.bf16.msra.mxu0 %v489_v17 }
  0x66   :  { %459 = vmatprep.subr.bf16.mxu0 %v616_v0 }
  0x68   :  { %442 = vmatpush3.bf16.msra.mxu1 %v483_v11 }
  0x69   :  { %460 = vmatpush3.bf16.msra.mxu0 %v490_v26 }
  0x6a   :  { %461 = vmatprep.subr.bf16.mxu0 %v616_v0 }
  0x6d   :  { %462 = vmatpush3.bf16.msra.mxu0 %v491_v27 }
 0x122   :  { %v132_v19 = vpop.f32.mrb[0].mxu0 }
 0x123   :  { %v133_v20 = vadd.f32 %v381_v18, %v132_v19  ;;  %v425_v21 = vpop.f32.mrb[1].mxu0 }
 0x124   :  { %v135_v22 = vpop.f32.mrb[2].mxu0 }
 0x125   :  { %v138_v23 = vmax.f32 %v133_v20, 0.0  ;;  %v426_v24 = vpop.f32.mrb[3].mxu0 }
 0x127   :  { %v139_v25 = vpack.c.bf16 %v138_v23, %v138_v23 }
 0x129   :  { %444 = vmatmul.mubr.bf16.vlgmr.msra.gmra.mrb[0].mxu1 %v139_v25 }
 0x1fc   :  { %v244_v29 = vpop.f32.mrb[0].mxu1 }
 0x1fd   :  { %v245_v30 = vadd.f32 %v383_v28, %v244_v29  ;;  %v445_v31 = vpop.f32.mrb[1].mxu1 }
 0x1fe   :  { %v247_v32 = vpop.f32.mrb[2].mxu1 }
 0x1ff   :  { %v250_v33 = vmax.f32 %v245_v30, 0.0  ;;  %v446_v34 = vpop.f32.mrb[3].mxu1 }
 0x201   :  { %v251_v35 = vpack.c.bf16 %v250_v33, %v250_v33 }
 0x203   :  { %464 = vmatmul.mubr.bf16.vlgmr.msra.gmra.mrb[4].mxu0 %v251_v35 }
 0x2d6   :  { %v356_v37 = vpop.f32.mrb[4].mxu0 }
 0x2d7   :  { %v357_v38 = vadd.f32 %v392_v36, %v356_v37  ;;  %v465_v39 = vpop.f32.mrb[5].mxu0 }
 0x2d8   :  { %v359_v40 = vpop.f32.mrb[6].mxu0 }
 0x2d9   :  { %v362_v41 = vpack.c.bf16 %v357_v38, %v357_v38  ;;  %v466_v42 = vpop.f32.mrb[7].mxu0 }
 0x2db   :  { %363 = vst [vmem:[#allocation10] sm:$0xf] %v362_v41 }
 0x2dc   :  { %591 = shalt.err (!%p588_p8)
}
 0x2dd   :  { %s592_s6 = scalar_lea.hbm %s758_s7, 64 }
 0x2de   :  { %p593_p9 = scmp.ne.s32.totalorder %s758_s7, %s592_s6  ;;  %p596_p10 = scmp.lt.u32.totalorder %s592_s6, %s758_s7 }
 0x2e0   :  { %p598_p11 = pnand %p596_p10, %p593_p9 }
 0x2e2   :  { %601 = shalt.err (!%p598_p11)
}
 0x2e3   :  { %373 = dma.vmem_to_hbm [thread:$0]  %s371_s30, 64, %s758_s7, [#allocation4]  }
 0x2e4   :  { %608 = dma.done.wait [#allocation4], 64  }
 0x2e5   :  { %609 = vsyncadd [#allocation4], 4294967232 }
 0x2e6   :  { %377 = vsyncpa [#allocation3], 1 }
 0x2e7   :  { %378 = vsyncpa [#allocation6], 1 }
 0x2e8   :  { %379 = vsyncpa [#allocation9], 1 }
 0x2e9   :  { %380 = vsyncpa [#allocation4], 1 }

</bundles_post_ra>
